<compile_context>
chip_gen: v7x
topology: tpu7x:2x2x1
jax: 0.10.0
libtpu: 0.0.40
codegen_flags: <defaults>
</compile_context>

<pallas_src>
import functools

import jax
import jax.numpy as jnp
from jax.experimental import pallas as pl
from jax.experimental.pallas import tpu as pltpu

EPS = 1e-5
_VMEM_LIMIT = 32 * 1024 * 1024  # within the default scoped VMEM on v5e/v6e/v7x


def _round_up(x, m):
    return (x + m - 1) // m * m


# ---------------------------------------------------------------------------
# Kernels
# ---------------------------------------------------------------------------
def _conv_band_kernel(x_ref, scale_ref, shift_ref, w_ref, z_ref, s_ref,
                      *, apply_bn_relu):
    """[optional fused BN+ReLU] -> 3x3 conv (3 banded matmuls) -> partial stats.

    x_ref    : (1, H, L_in)    activation slab, lane index = w*Cp + c
    scale_ref: (1, L_in)       folded BN scale  (gamma * rsqrt(var+eps))
    shift_ref: (1, L_in)       folded BN shift  (beta - mean*scale)
    w_ref    : (3, L_in, L_out) banded weights (one band per kh tap), bf16
    z_ref    : (1, H, L_out)   raw conv output (pre-BN), f32
    s_ref    : (1, 2, L_out)   partial [sum, sum_sq] over rows of this block
    """
    h = x_ref.shape[1]

    x = x_ref[0].astype(jnp.float32)                       # (H, L_in)
    if apply_bn_relu:
        x = jnp.maximum(x * scale_ref[...] + shift_ref[...], 0.0)

    # H-direction 'same' padding: two zero halo rows inserted *after* BN+ReLU
    # (so they are true conv zero-padding).  W-direction padding is already
    # encoded in the banded weight matrices.
    zrow = jnp.zeros((1, x.shape[1]), jnp.float32)
    xp = jnp.concatenate([zrow, x, zrow], axis=0)          # (H+2, L_in)

    acc = None
    for kh in range(3):                                    # 3 matmuls, K = L_in
        a = xp[kh:kh + h].astype(jnp.bfloat16)             # bf16 MXU operands
        d = jnp.dot(a, w_ref[kh], preferred_element_type=jnp.float32)
        acc = d if acc is None else acc + d                # (H, L_out) f32

    z_ref[0] = acc
    s0 = jnp.sum(acc, axis=0, keepdims=True)               # (1, L_out)
    s1 = jnp.sum(acc * acc, axis=0, keepdims=True)         # (1, L_out)
    s_ref[0] = jnp.concatenate([s0, s1], axis=0)           # (2, L_out)


def _bn_relu_kernel(z_ref, scale_ref, shift_ref, o_ref):
    o_ref[0] = jnp.maximum(z_ref[0] * scale_ref[...] + shift_ref[...], 0.0)


# ---------------------------------------------------------------------------
# pallas_call stage builders
# ---------------------------------------------------------------------------
def _conv_stage(x_slab, scale_lane, shift_lane, w_band, *, apply_bn_relu):
    n, h, l_in = x_slab.shape
    l_out = w_band.shape[-1]
    kernel = functools.partial(_conv_band_kernel, apply_bn_relu=apply_bn_relu)
    z, stats = pl.pallas_call(
        kernel,
        grid=(n,),
        in_specs=[
            pl.BlockSpec((1, h, l_in), lambda i: (i, 0, 0)),
            pl.BlockSpec((1, l_in), lambda i: (0, 0)),
            pl.BlockSpec((1, l_in), lambda i: (0, 0)),
            pl.BlockSpec((3, l_in, l_out), lambda i: (0, 0, 0)),
        ],
        out_specs=[
            pl.BlockSpec((1, h, l_out), lambda i: (i, 0, 0)),
            pl.BlockSpec((1, 2, l_out), lambda i: (i, 0, 0)),
        ],
        out_shape=[
            jax.ShapeDtypeStruct((n, h, l_out), jnp.float32),
            jax.ShapeDtypeStruct((n, 2, l_out), jnp.float32),
        ],
        compiler_params=pltpu.CompilerParams(
            dimension_semantics=("parallel",),
            vmem_limit_bytes=_VMEM_LIMIT,
        ),
    )(x_slab, scale_lane, shift_lane, w_band)
    return z, stats


def _bn_relu_stage(z_slab, scale_lane, shift_lane):
    n, h, l = z_slab.shape
    return pl.pallas_call(
        _bn_relu_kernel,
        grid=(n,),
        in_specs=[
            pl.BlockSpec((1, h, l), lambda i: (i, 0, 0)),
            pl.BlockSpec((1, l), lambda i: (0, 0)),
            pl.BlockSpec((1, l), lambda i: (0, 0)),
        ],
        out_specs=pl.BlockSpec((1, h, l), lambda i: (i, 0, 0)),
        out_shape=jax.ShapeDtypeStruct((n, h, l), jnp.float32),
        compiler_params=pltpu.CompilerParams(
            dimension_semantics=("parallel",),
            vmem_limit_bytes=_VMEM_LIMIT,
        ),
    )(z_slab, scale_lane, shift_lane)


# ---------------------------------------------------------------------------
# Wrapper glue (layout, banded weights, BN stat finalization)
# ---------------------------------------------------------------------------
def _banded_conv_matrix(w_oihw, width, cinp, coutp):
    """PyTorch OIHW 3x3 weights -> (3, W*CinP, W*CoutP) banded matrices (bf16).

    band[kh][win*CinP + ci, wout*CoutP + co] = w[co, ci, kh, win - wout + 1]
    (zero outside the band) — this folds the kw taps AND the W-direction zero
    padding of 'same' conv into a single deep matmul per kh tap.
    """
    cout, cin, _, _ = w_oihw.shape
    wt = jnp.transpose(w_oihw, (2, 3, 1, 0)).astype(jnp.float32)  # (3,3,Cin,Cout)
    wt = jnp.pad(wt, ((0, 0), (0, 0), (0, cinp - cin), (0, coutp - cout)))
    bands = []
    for kh in range(3):
        m = jnp.zeros((width * cinp, width * coutp), jnp.float32)
        for kw in range(3):
            shift = jnp.eye(width, k=1 - kw, dtype=jnp.float32)   # win = wout+kw-1
            m = m + jnp.kron(shift, wt[kh, kw])
        bands.append(m)
    return jnp.stack(bands).astype(jnp.bfloat16)


def _finalize_bn(stats, gamma_p, beta_p, count, width, cp):
    """Reduce per-batch partial (sum, sum_sq) -> folded per-lane scale/shift."""
    s = stats.sum(axis=0)                       # (2, W*Cp)
    s = s.reshape(2, width, cp).sum(axis=1)     # (2, Cp)  per-channel sums
    mean = s[0] / count
    var = jnp.maximum(s[1] / count - mean * mean, 0.0)   # biased, one-pass
    invstd = jax.lax.rsqrt(var + EPS)
    scale_c = gamma_p * invstd
    shift_c = beta_p - mean * scale_c
    scale_lane = jnp.tile(scale_c, width).reshape(1, width * cp)
    shift_lane = jnp.tile(shift_c, width).reshape(1, width * cp)
    return scale_lane, shift_lane


def double_conv(x_nchw, params):
    """x_nchw: (N, Cin, H, W) -> (N, Cout, H, W), matching PyTorch DoubleConv
    (training-mode BatchNorm statistics, eps=1e-5)."""
    w1, b1, g1, bt1, w2, b2, g2, bt2 = params  # b1/b2 unused: bias cancels under BN
    n, cin, h, w = x_nchw.shape
    cout = w1.shape[0]
    cinp = _round_up(cin, 8)
    coutp = _round_up(cout, 8)
    l1 = w * cinp
    l2 = w * coutp

    # NCHW -> lane-fused (N, H, W*CinP) slab, channels zero-padded to CinP.
    x_nhwc = jnp.transpose(x_nchw, (0, 2, 3, 1)).astype(jnp.float32)
    x_nhwc = jnp.pad(x_nhwc, ((0, 0), (0, 0), (0, 0), (0, cinp - cin)))
    x_slab = x_nhwc.reshape(n, h, l1)

    w1_band = _banded_conv_matrix(w1, w, cinp, coutp)    # (3, L1, L2) bf16
    w2_band = _banded_conv_matrix(w2, w, coutp, coutp)   # (3, L2, L2) bf16

    ones1 = jnp.ones((1, l1), jnp.float32)
    zeros1 = jnp.zeros((1, l1), jnp.float32)

    # Stage 1: conv1  (+ partial BN1 stats)
    z1, st1 = _conv_stage(x_slab, ones1, zeros1, w1_band, apply_bn_relu=False)

    g1p = jnp.pad(g1.astype(jnp.float32), (0, coutp - cout), constant_values=1.0)
    b1p = jnp.pad(bt1.astype(jnp.float32), (0, coutp - cout))
    scale1, shift1 = _finalize_bn(st1, g1p, b1p, n * h * w, w, coutp)

    # Stage 2: bn1 + relu fused into conv2  (+ partial BN2 stats)
    z2, st2 = _conv_stage(z1, scale1, shift1, w2_band, apply_bn_relu=True)

    g2p = jnp.pad(g2.astype(jnp.float32), (0, coutp - cout), constant_values=1.0)
    b2p = jnp.pad(bt2.astype(jnp.float32), (0, coutp - cout))
    scale2, shift2 = _finalize_bn(st2, g2p, b2p, n * h * w, w, coutp)

    # Stage 3: bn2 + relu
    out_slab = _bn_relu_stage(z2, scale2, shift2)

    out_nhwc = out_slab.reshape(n, h, w, coutp)[..., :cout]
    return jnp.transpose(out_nhwc, (0, 3, 1, 2))


def init_params(key, in_ch, out_ch):
    """Deterministic synthetic parameters (shapes match nn.Conv2d/BatchNorm2d)."""
    k1, k2, k3, k4 = jax.random.split(key, 4)
    w1 = 0.1 * jax.random.normal(k1, (out_ch, in_ch, 3, 3), jnp.float32)
    b1 = 0.1 * jax.random.normal(k2, (out_ch,), jnp.float32)
    w2 = 0.1 * jax.random.normal(k3, (out_ch, out_ch, 3, 3), jnp.float32)
    b2 = 0.1 * jax.random.normal(k4, (out_ch,), jnp.float32)
    g1 = jnp.ones((out_ch,), jnp.float32)     # BatchNorm gamma init = 1
    bt1 = jnp.zeros((out_ch,), jnp.float32)   # BatchNorm beta  init = 0
    g2 = jnp.ones((out_ch,), jnp.float32)
    bt2 = jnp.zeros((out_ch,), jnp.float32)
    return (w1, b1, g1, bt1, w2, b2, g2, bt2)


if __name__ == "__main__":
    key = jax.random.PRNGKey(0)
    kx, kp = jax.random.split(key)

    N, C_IN, C_OUT, H, W = 2, 4, 8, 16, 16
    x = jax.random.normal(kx, (N, C_IN, H, W), jnp.float32)
    params = init_params(kp, C_IN, C_OUT)

    # TODO(synk): PyTorch training-mode BatchNorm2d also updates
    # running_mean/running_var buffers; only the forward activation is produced.
    out = double_conv(x, params)
    out = jax.block_until_ready(out)
    assert out.shape == (N, C_OUT, H, W), out.shape
    assert bool(jnp.all(jnp.isfinite(out)))
    print("KERNEL_OK")
</pallas_src>

<mosaic_0001>
module attributes {stable_mosaic.version = 11 : i64} {
  func.func @_conv_band_kernel(%arg0: i32, %arg1: memref<1x16x128xf32, #tpu.memory_space<vmem>>, %arg2: memref<1x128xf32, #tpu.memory_space<vmem>>, %arg3: memref<1x128xf32, #tpu.memory_space<vmem>>, %arg4: memref<3x128x128xbf16, #tpu.memory_space<vmem>>, %arg5: memref<1x16x128xf32, #tpu.memory_space<vmem>>, %arg6: memref<1x2x128xf32, #tpu.memory_space<vmem>>) attributes {dimension_semantics = [#tpu.dimension_semantics<parallel>], iteration_bounds = array<i64: 2>, scalar_prefetch = 0 : i64, scratch_operands = 0 : i64, tpu.core_type = #tpu.core_type<tc>, window_params = [{transform_indices = @transform_0, window_bounds = array<i64: 1, 16, 128>}, {pipeline_mode = #tpu.pipeline_mode<synchronous>, transform_indices = @transform_1, window_bounds = array<i64: 1, 128>}, {pipeline_mode = #tpu.pipeline_mode<synchronous>, transform_indices = @transform_2, window_bounds = array<i64: 1, 128>}, {pipeline_mode = #tpu.pipeline_mode<synchronous>, transform_indices = @transform_3, window_bounds = array<i64: 3, 128, 128>}, {transform_indices = @transform_4, window_bounds = array<i64: 1, 16, 128>}, {transform_indices = @transform_5, window_bounds = array<i64: 1, 2, 128>}]} {
    %c0 = arith.constant 0 : index
    %c0_0 = arith.constant 0 : index
    %c0_1 = arith.constant 0 : index
    %0 = vector.load %arg1[%c0, %c0_0, %c0_1] : memref<1x16x128xf32, #tpu.memory_space<vmem>>, vector<1x16x128xf32>
    %1 = vector.shape_cast %0 : vector<1x16x128xf32> to vector<16x128xf32>
    %cst = arith.constant 0.000000e+00 : f32
    %2 = vector.broadcast %cst : f32 to vector<1x128xf32>
    %3 = tpu.concatenate %2, %1, %2 in 0 : vector<1x128xf32>, vector<16x128xf32>, vector<1x128xf32> -> vector<18x128xf32>
    %4 = vector.extract_strided_slice %3 {offsets = [0, 0], sizes = [16, 128], strides = [1, 1]} : vector<18x128xf32> to vector<16x128xf32>
    %5 = arith.truncf %4 : vector<16x128xf32> to vector<16x128xbf16>
    %c0_2 = arith.constant 0 : index
    %c0_3 = arith.constant 0 : index
    %c0_4 = arith.constant 0 : index
    %6 = vector.load %arg4[%c0_2, %c0_3, %c0_4] : memref<3x128x128xbf16, #tpu.memory_space<vmem>>, vector<1x128x128xbf16>
    %7 = vector.shape_cast %6 : vector<1x128x128xbf16> to vector<128x128xbf16>
    %cst_5 = arith.constant dense<0.000000e+00> : vector<16x128xf32>
    %8 = tpu.matmul %5, %7, %cst_5 {dimension_numbers = #tpu.dot_dimension_numbers<[1], [0], [0], [1], [0, 0, 1, 1], [], []>} : vector<16x128xbf16>, vector<128x128xbf16>, vector<16x128xf32> -> vector<16x128xf32>
    %9 = vector.extract_strided_slice %3 {offsets = [1, 0], sizes = [16, 128], strides = [1, 1]} : vector<18x128xf32> to vector<16x128xf32>
    %10 = arith.truncf %9 : vector<16x128xf32> to vector<16x128xbf16>
    %c1 = arith.constant 1 : index
    %c0_6 = arith.constant 0 : index
    %c0_7 = arith.constant 0 : index
    %11 = vector.load %arg4[%c1, %c0_6, %c0_7] : memref<3x128x128xbf16, #tpu.memory_space<vmem>>, vector<1x128x128xbf16>
    %12 = vector.shape_cast %11 : vector<1x128x128xbf16> to vector<128x128xbf16>
    %cst_8 = arith.constant dense<0.000000e+00> : vector<16x128xf32>
    %13 = tpu.matmul %10, %12, %cst_8 {dimension_numbers = #tpu.dot_dimension_numbers<[1], [0], [0], [1], [0, 0, 1, 1], [], []>} : vector<16x128xbf16>, vector<128x128xbf16>, vector<16x128xf32> -> vector<16x128xf32>
    %14 = arith.addf %8, %13 : vector<16x128xf32>
    %15 = vector.extract_strided_slice %3 {offsets = [2, 0], sizes = [16, 128], strides = [1, 1]} : vector<18x128xf32> to vector<16x128xf32>
    %16 = arith.truncf %15 : vector<16x128xf32> to vector<16x128xbf16>
    %c2 = arith.constant 2 : index
    %c0_9 = arith.constant 0 : index
    %c0_10 = arith.constant 0 : index
    %17 = vector.load %arg4[%c2, %c0_9, %c0_10] : memref<3x128x128xbf16, #tpu.memory_space<vmem>>, vector<1x128x128xbf16>
    %18 = vector.shape_cast %17 : vector<1x128x128xbf16> to vector<128x128xbf16>
    %cst_11 = arith.constant dense<0.000000e+00> : vector<16x128xf32>
    %19 = tpu.matmul %16, %18, %cst_11 {dimension_numbers = #tpu.dot_dimension_numbers<[1], [0], [0], [1], [0, 0, 1, 1], [], []>} : vector<16x128xbf16>, vector<128x128xbf16>, vector<16x128xf32> -> vector<16x128xf32>
    %20 = arith.addf %14, %19 : vector<16x128xf32>
    %c0_12 = arith.constant 0 : index
    %c0_13 = arith.constant 0 : index
    %c0_14 = arith.constant 0 : index
    %21 = vector.load %arg5[%c0_12, %c0_13, %c0_14] : memref<1x16x128xf32, #tpu.memory_space<vmem>>, vector<1x16x128xf32>
    %22 = vector.shape_cast %21 : vector<1x16x128xf32> to vector<16x128xf32>
    %23 = vector.shape_cast %20 : vector<16x128xf32> to vector<1x16x128xf32>
    tpu.vector_store %arg5[%c0_12, %c0_13, %c0_14], %23 {strides = array<i32>} : memref<1x16x128xf32, #tpu.memory_space<vmem>>, vector<1x16x128xf32>,
    %cst_15 = arith.constant dense<0.000000e+00> : vector<128xf32>
    %24 = vector.multi_reduction <add>, %20, %cst_15 [0] : vector<16x128xf32> to vector<128xf32>
    %25 = vector.shape_cast %24 : vector<128xf32> to vector<1x128xf32>
    %26 = arith.mulf %20, %20 : vector<16x128xf32>
    %cst_16 = arith.constant dense<0.000000e+00> : vector<128xf32>
    %27 = vector.multi_reduction <add>, %26, %cst_16 [0] : vector<16x128xf32> to vector<128xf32>
    %28 = vector.shape_cast %27 : vector<128xf32> to vector<1x128xf32>
    %29 = tpu.concatenate %25, %28 in 0 : vector<1x128xf32>, vector<1x128xf32> -> vector<2x128xf32>
    %c0_17 = arith.constant 0 : index
    %c0_18 = arith.constant 0 : index
    %c0_19 = arith.constant 0 : index
    %30 = vector.load %arg6[%c0_17, %c0_18, %c0_19] : memref<1x2x128xf32, #tpu.memory_space<vmem>>, vector<1x2x128xf32>
    %31 = vector.shape_cast %30 : vector<1x2x128xf32> to vector<2x128xf32>
    %32 = vector.shape_cast %29 : vector<2x128xf32> to vector<1x2x128xf32>
    tpu.vector_store %arg6[%c0_17, %c0_18, %c0_19], %32 {strides = array<i32>} : memref<1x2x128xf32, #tpu.memory_space<vmem>>, vector<1x2x128xf32>,
    return
  }
  func.func @transform_0(%arg0: i32) -> (i32, i32, i32) {
    %c0_i32 = arith.constant 0 : i32
    %c0_i32_0 = arith.constant 0 : i32
    %c0_i32_1 = arith.constant 0 : i32
    return %arg0, %c0_i32, %c0_i32_0 : i32, i32, i32
  }
  func.func @transform_1(%arg0: i32) -> (i32, i32) {
    %c0_i32 = arith.constant 0 : i32
    %c0_i32_0 = arith.constant 0 : i32
    %c0_i32_1 = arith.constant 0 : i32
    return %c0_i32, %c0_i32_0 : i32, i32
  }
  func.func @transform_2(%arg0: i32) -> (i32, i32) {
    %c0_i32 = arith.constant 0 : i32
    %c0_i32_0 = arith.constant 0 : i32
    %c0_i32_1 = arith.constant 0 : i32
    return %c0_i32, %c0_i32_0 : i32, i32
  }
  func.func @transform_3(%arg0: i32) -> (i32, i32, i32) {
    %c0_i32 = arith.constant 0 : i32
    %c0_i32_0 = arith.constant 0 : i32
    %c0_i32_1 = arith.constant 0 : i32
    %c0_i32_2 = arith.constant 0 : i32
    return %c0_i32, %c0_i32_0, %c0_i32_1 : i32, i32, i32
  }
  func.func @transform_4(%arg0: i32) -> (i32, i32, i32) {
    %c0_i32 = arith.constant 0 : i32
    %c0_i32_0 = arith.constant 0 : i32
    %c0_i32_1 = arith.constant 0 : i32
    return %arg0, %c0_i32, %c0_i32_0 : i32, i32, i32
  }
  func.func @transform_5(%arg0: i32) -> (i32, i32, i32) {
    %c0_i32 = arith.constant 0 : i32
    %c0_i32_0 = arith.constant 0 : i32
    %c0_i32_1 = arith.constant 0 : i32
    return %arg0, %c0_i32, %c0_i32_0 : i32, i32, i32
  }
}

</mosaic_0001>

<bundles_post_ra>
// kernel: tpu_custom_call.1
= control target key start
LH: loop header
LB: loop body
LE: loop exit
PB: predicated region body
PF: predicated region fallthrough
CT: control target
= control target key end

     0   :  { %11 = vsyncpa [#allocation3], 0  ;;  %s1510_s0 = inlined_call_operand.hbm [shape: f32[2,16,128], index: 0, kind: input, shape index: {}]   ;;  %s1511_s1 = inlined_call_operand.vmem [shape: f32[1,128], index: 1, kind: input, shape index: {}]   ;;  %s1512_s2 = inlined_call_operand.vmem [shape: f32[1,128], index: 2, kind: input, shape index: {}]   ;;  %s1513_s3 = inlined_call_operand.hbm [shape: bf16[3,128,128], index: 3, kind: input, shape index: {}]   ;;  %s1514_s4 = inlined_call_operand.hbm [shape: f32[2,16,128], index: 4, kind: output, shape index: {0}]   ;;  %s1515_s5 = inlined_call_operand.hbm [shape: f32[2,2,128], index: 5, kind: output, shape index: {1}]  }
   0x1   :  { %13 = vsyncpa [#allocation3 + $0x1], 0 }
   0x2   :  { %14 = vsyncpa [#allocation6], 0 }
   0x3   :  { %15 = vsyncpa [#allocation4], 0 }
   0x4   :  { %17 = vsyncpa [#allocation4 + $0x1], 0 }
   0x5   :  { %18 = vsyncpa [#allocation9], 0 }
   0x6   :  { %20 = vsyncpa [#allocation9 + $0x1], 0  ;;  %s1234_s1 = smov 0   ;;  %s1236_s18 = smov 0  }
   0x7   :  { %s1238_s2 = smov 0   ;;  %s1240_s19 = smov 0  }
   0x8 LB: > { %s1255_s20 = sadd.s32 4294967295, %s1189_s19   ;;  %s792_s21 = sadd.s32 4294967294, %s1189_s19   ;;  %s1189_s19 = sphi %s1240_s19, %s1535_s19   ;;  %s1185_s2 = sphi %s1238_s2, %s1534_s2   ;;  %s1181_s18 = sphi %s1236_s18, %s1533_s18   ;;  %s1177_s1 = sphi %s1234_s1, %s1532_s1  }
   0x9   : > { %p46_p0 = scmp.ne.s32.totalorder %s1181_s18, %s1177_s1  ;;  %p1516_p1 = scmp.eq.s32.totalorder %s1255_s20, 0 }
   0xa   : > { %p139_p3 = scmp.eq.s32.totalorder %s792_s21, 1  ;;  %p793_p5 = scmp.ge.s32.totalorder %s1189_s19, 1 }
   0xb   : > { %p1264_p4 = por %p1516_p1, %p46_p0  ;;  %p172_p7 = scmp.lt.s32.totalorder %s1189_s19, 3 }
   0xc   : > { %p1269_p6 = por %p139_p3, %p46_p0  ;;  %s1191_s25 = smov [#allocation5]  }
   0xd   : > { %s1519_s22 = scalar_select %p1264_p4, 1, 0 }
   0xe   : > { %s1520_s23 = scalar_select %p1269_p6, 1, 0 }
   0xf   : > { %p1274_p8 = pnand %p793_p5, %p172_p7  ;;  %s190_s26 = sshll.u32 %s1191_s25, 4  ;;  %s1278_s26 = int_to_ptr.vmem [resolvable:$true] %s190_s26 }
  0x10   : > { %s1290_s28 = sadd.s32 1, %s1189_s19   ;;  %s33_s29 = sadd.s32 1, %s1185_s2 }
  0x11   : > { %s1521_s24 = scalar_select %p1274_p8, 1, 0 }
  0x12   : > { %p944_p9 = pneg %p1274_p8  ;;  %s30_s30 = ssub.s32 %s1189_s19, %s1290_s28 }
  0x13   : > { %s1029_s8 = scalar_lea.hbm %s1513_s3, 3072 }
  0x14   : > { %p1285_p11 = pnand %p944_p9, %p1516_p1  ;;  %p1030_p12 = scmp.ne.s32.totalorder %s1513_s3, %s1029_s8 }
  0x15   : > { %p1036_p5 = scmp.lt.u32.totalorder %s1029_s8, %s1513_s3 }
  0x16   : > { %p1031_p13 = pneg %p1285_p11 }
  0x18   : > { %p1032_p0 = pnand %p1031_p13, %p1030_p12 }
  0x1a   : > { %p1033_p3 = pneg %p1032_p0 }
  0x1c   : > { %p1038_p7 = pnand %p1036_p5, %p1033_p3 }
  0x1e   : > { %1041 = shalt.err (!%p1038_p7)
}
  0x1f   : > { %s1042_s13 = scalar_lea.vmem %s1278_s26, 3072  ;;  %p1050_p2 = scmp.lt.s32.totalorder %s1278_s26, %s1278_s26 }
  0x20   : > { %p1043_p9 = scmp.ne.s32.totalorder %s1278_s26, %s1042_s13  ;;  %p1051_p6 = scmp.lt.s32.totalorder %s1042_s13, %s1042_s13 }
  0x22   : > { %p1045_p10 = pnand %p1043_p9, %p1031_p13  ;;  %p1052_p4 = por %p1051_p6, %p1050_p2 }
  0x24   : > { %p1046_p1 = pneg %p1045_p10 }
  0x26   : > { %p1053_p8 = pnand %p1052_p4, %p1046_p1 }
  0x28   : > { %1056 = shalt.err (!%p1053_p8)
}
  0x29   : > { %s1192_s14 = smov 64   ;;  %s1193_s15 = smov 4  }
  0x2a   : > { %947 = dma.hbm_to_vmem [thread:$0]  (!%p1285_p11), %s1513_s3, 3072, %s1278_s26, [#allocation6], %s1192_s14, %s1192_s14, %s1193_s15  }
  0x2b   : > { %p31_p2 = scmp.eq.s32.totalorder %s30_s30, 0  ;;  %p40_p1 = scmp.ne.s32.totalorder %s1185_s2, %s1181_s18 }
  0x2c   : > { %p41_p4 = scmp.eq.s32.totalorder %s1189_s19, 0  ;;  %p960_p6 = scmp.lt.s32.totalorder %s1189_s19, 2 }
  0x2d   : > { %s1321_s21 = scalar_select %p31_p2, %s1185_s2, %s33_s29  }
  0x2e   : > { %p42_p8 = por %p41_p4, %p40_p1  ;;  %p1523_p10 = scmp.eq.s32.totalorder %s1255_s20, 1 }
  0x2f   : > { %s204_s6 = sand.u32 1, %s1185_s2   ;;  %s839_s7 = sshll.u32 %s1189_s19, 8 }
  0x30   : > { %p1325_p12 = por %p1523_p10, %p40_p1  ;;  %s796_s8 = sshll.u32 %s204_s6, 4 }
  0x31   : > { %s1334_s10 = scalar_lea.hbm %s1510_s0, %s839_s7  ;;  %s208_s26 = scalar_lea.vmem [#allocation2], %s796_s8 }
  0x32   : > { %s215_s29 = sshll.u32 %s208_s26, 4  ;;  %p1336_p11 = pnand %p960_p6, %p42_p8  ;;  %s1340_s29 = int_to_ptr.vmem [resolvable:$true] %s215_s29 }
  0x33   : > { %s1342_s11 = scalar_lea.sflag [#allocation3], %s204_s6  ;;  %s1057_s12 = scalar_lea.hbm %s1334_s10, 256 }
  0x34   : > { %p1058_p13 = scmp.ne.s32.totalorder %s1334_s10, %s1057_s12  ;;  %p1059_p0 = pneg %p1336_p11 }
  0x35   : > { %s1062_s15 = scalar_lea.hbm %s1510_s0, 512  ;;  %p1063_p7 = scmp.lt.u32.totalorder %s1334_s10, %s1510_s0 }
  0x36   : > { %p1060_p3 = pnand %p1059_p0, %p1058_p13  ;;  %p1064_p9 = scmp.lt.u32.totalorder %s1062_s15, %s1057_s12 }
  0x37   : > { %p1066_p1 = scmp.lt.u32.totalorder %s1057_s12, %s1334_s10 }
  0x38   : > { %p1061_p5 = pneg %p1060_p3  ;;  %p1065_p2 = por %p1064_p9, %p1063_p7 }
  0x3a   : > { %p1067_p4 = por %p1066_p1, %p1065_p2 }
  0x3c   : > { %p1068_p6 = pnand %p1067_p4, %p1061_p5 }
  0x3e   : > { %1071 = shalt.err (!%p1068_p6)
}
  0x3f   : > { %s1072_s6 = scalar_lea.vmem %s1340_s29, 256  ;;  %s1194_s7 = smov [#allocation2]  }
  0x40   : > { %p1073_p8 = scmp.ne.s32.totalorder %s1340_s29, %s1072_s6  ;;  %s1077_s8 = sshll.u32 %s1194_s7, 4  ;;  %s1078_s8 = int_to_ptr.vmem [resolvable:$false] %s1077_s8 }
  0x41   : > { %s1079_s27 = scalar_lea.vmem %s1078_s8, 512  ;;  %p1080_p3 = scmp.lt.s32.totalorder %s1340_s29, %s1078_s8 }
  0x42   : > { %p1075_p10 = pnand %p1073_p8, %p1059_p0  ;;  %p1081_p7 = scmp.lt.s32.totalorder %s1079_s27, %s1072_s6 }
  0x44   : > { %p1076_p13 = pneg %p1075_p10  ;;  %p1082_p9 = por %p1081_p7, %p1080_p3 }
  0x46   : > { %p1083_p2 = pnand %p1082_p9, %p1076_p13 }
  0x48   : > { %1086 = shalt.err (!%p1083_p2)
}
  0x49   : > { %s1195_s9 = smov 128   ;;  %s1196_s26 = smov 8  }
  0x4a   : > { %951 = dma.hbm_to_vmem [thread:$0]  (!%p1336_p11), %s1334_s10, 256, %s1340_s29, %s1342_s11, %s1195_s9, %s1195_s9, %s1196_s26  }
  0x4b   : > { %p1526_p0 = scmp.ne.s32.totalorder %s1521_s24, 0 }
  0x4c   : > { %s1373_s12 = sand.u32 (!%p1526_p0), 1, %s1181_s18   ;;  %p1527_p5 = scmp.ne.s32.totalorder (!%p1526_p0), %s1519_s22, 0 }
  0x4d   : > { %227 = sbr.rel (%p1526_p0) target bundleno = 412 (0x19c), region = 36  ;;  %s800_s13 = sshll.u32 (!%p1526_p0), %s1373_s12, 4 }
  0x4e   : > { %s230_s14 = scalar_lea.sflag (!%p1526_p0), [#allocation3], %s1373_s12  ;;  %s233_s15 = scalar_lea.vmem (!%p1526_p0), [#allocation2], %s800_s13 }
  0x54   : > { %1160 = dma.done.wait (%p1527_p5), %s230_s14, 256  }
  0x55   : > { %1162 = vsyncadd (%p1527_p5), %s230_s14, 4294967040  ;;  %p1528_p11 = scmp.eq.s32.totalorder %s1255_s20, 0 }
  0x57   : > { %1164 = dma.done.wait (%p1528_p11), [#allocation6], 3072   ;;  %p1529_p1 = pmov %p1528_p11 }
  0x58   : > { %v1197_v0 = vmov 0.0   ;;  %vm1198_vm0 = vmmov 0   ;;  %v1005_v1 = vld [vmem:[#allocation5] sm:$0xff]   ;;  %v1006_v2 = vld [vmem:[#allocation5 + $0x8] sm:$0xff]   ;;  %v1007_v3 = vld [vmem:[#allocation5 + $0x10] sm:$0xff]   ;;  %vm274_vm1 = vcmask 1040384  }
  0x59   : > { %1166 = vsyncadd (%p1529_p1), [#allocation6], 4294964224  ;;  %888 = vmatprep.subr.bf16.mxu0 %v1197_v0  ;;  %868 = vmatprep.subr.bf16.mxu1 %v1197_v0  ;;  %v1013_v4 = vld [vmem:[#allocation5 + $0x40] sm:$0xff]   ;;  %v1008_v5 = vld [vmem:[#allocation5 + $0x18] sm:$0xff]   ;;  %vm1199_vm3 = vmmov 1   ;;  %vm529_vm6 = vcmask 1046528  }
  0x5a   : > { %904 = vmatprep.mubr.msk.bf16.mxu0 %vm1198_vm0, %v1197_v0  ;;  %884 = vmatprep.mubr.msk.bf16.mxu1 %vm1198_vm0, %v1197_v0  ;;  %v1015_v6 = vld [vmem:[#allocation5 + $0x48] sm:$0xff]   ;;  %v1009_v7 = vld [vmem:[#allocation5 + $0x20] sm:$0xff]   ;;  %v1017_v10 = vld [vmem:[#allocation5 + $0x50] sm:$0xff]   ;;  %vm318_vm5 = vsmask.f32 7424  ;;  %s261_s22 = scalar_lea.vmem [#allocation7], %s800_s13 }
  0x5b   : > { %889 = vmatpush3.bf16.msra.mxu0 %v1005_v1  ;;  %869 = vmatpush3.bf16.msra.mxu1 %v1013_v4  ;;  %v270_v8 = vld [vmem:[%s233_s15] sm:$0xff]  ;;  %v271_v9 = vld [vmem:[%s233_s15 + $0x8] sm:$0xff]  ;;  %vm820_vm2 = vmneg %vm274_vm1  ;;  %s664_s24 = sshll.u32 %s261_s22, 4  ;;  %s840_s10 = sshll.u32 %s1255_s20, 8  ;;  %s1429_s24 = int_to_ptr.vmem [resolvable:$true] %s664_s24 }
  0x5c   : > { %890 = vmatprep.subr.bf16.mxu0 %v1197_v0  ;;  %870 = vmatprep.subr.bf16.mxu1 %v1197_v0  ;;  %v1010_v11 = vld [vmem:[#allocation5 + $0x28] sm:$0xff]   ;;  %v275_v12 = vrot.slane %v270_v8, 7  ;;  %v276_v13 = vrot.slane %v271_v9, 7  ;;  %v1019_v14 = vld [vmem:[#allocation5 + $0x58] sm:$0xff]   ;;  %v1011_v16 = vld [vmem:[#allocation5 + $0x30] sm:$0xff]   ;;  %s1434_s11 = scalar_lea.hbm %s1514_s4, %s840_s10  ;;  %s646_s16 = scalar_lea.sflag [#allocation4], %s1373_s12 }
  0x5d   : > { %v1021_v19 = vld [vmem:[#allocation5 + $0x60] sm:$0xff]   ;;  %v1012_v21 = vld [vmem:[#allocation5 + $0x38] sm:$0xff]   ;;  %v1023_v22 = vld [vmem:[#allocation5 + $0x68] sm:$0xff]   ;;  %s1087_s17 = scalar_lea.vmem %s1429_s24, 256  ;;  %s1200_s6 = smov [#allocation7]  }
  0x5e   : > { %v281_v15 = vsel %vm274_vm1, 0.0, %v275_v12  ;;  %v277_v17 = vsel %vm274_vm1, %v275_v12, %v276_v13  ;;  %v282_v20 = vsel %vm274_vm1, %v276_v13, 0.0  ;;  %vm821_vm4 = vmpackc.low %vm1199_vm3, %vm820_vm2  ;;  %v1014_v26 = vld [vmem:[#allocation5 + $0x80] sm:$0xff]   ;;  %v1025_v27 = vld [vmem:[#allocation5 + $0x70] sm:$0xff]   ;;  %p1088_p4 = scmp.ne.s32.totalorder %s1429_s24, %s1087_s17  ;;  %s1091_s7 = sshll.u32 %s1200_s6, 4  ;;  %s1092_s7 = int_to_ptr.vmem [resolvable:$false] %s1091_s7 }
  0x5f   : > { %891 = vmatpush3.bf16.msra.mxu0 %v1006_v2  ;;  %871 = vmatpush3.bf16.msra.mxu1 %v1015_v6  ;;  %v1403_v18 = vpack.c.bf16 %v277_v17, %v281_v15  ;;  %v300_v23 = vpack.c.bf16 %v282_v20, %v282_v20  ;;  %v822_v25 = vpack.c.bf16 %v277_v17, %v275_v12  ;;  %v1016_v31 = vld [vmem:[#allocation5 + $0x88] sm:$0xff]   ;;  %v1027_v32 = vld [vmem:[#allocation5 + $0x78] sm:$0xff]   ;;  %v1018_v35 = vld [vmem:[#allocation5 + $0x90] sm:$0xff]   ;;  %s1093_s8 = scalar_lea.vmem %s1092_s7, 512  ;;  %p1094_p10 = scmp.lt.s32.totalorder %s1429_s24, %s1092_s7 }
  0x60   : > { %892 = vmatprep.subr.bf16.mxu0 %v1197_v0  ;;  %872 = vmatprep.subr.bf16.mxu1 %v1197_v0  ;;  %v1020_v37 = vld [vmem:[#allocation5 + $0x98] sm:$0xff]   ;;  %v1022_v38 = vld [vmem:[#allocation5 + $0xa0] sm:$0xff]   ;;  %v1024_v39 = vld [vmem:[#allocation5 + $0xa8] sm:$0xff]   ;;  %p1089_p6 = pnand %p1088_p4, %p1325_p12  ;;  %p1095_p13 = scmp.lt.s32.totalorder %s1093_s8, %s1087_s17 }
  0x61   : > { %v322_v24 = vshll.u32 %v1403_v18, 16  ;;  %v320_v28 = vshrl.u32 %v1403_v18, 16  ;;  %v327_v30 = vshll.u32 %v300_v23, 16  ;;  %v1026_v40 = vld [vmem:[#allocation5 + $0xb0] sm:$0xff]   ;;  %v1028_v41 = vld [vmem:[#allocation5 + $0xb8] sm:$0xff]   ;;  %v530_v42 = vrot.slane %v1403_v18, 1 }
  0x62   : > { %v531_v43 = vrot.slane %v300_v23, 1  ;;  %p1090_p8 = pneg %p1089_p6  ;;  %p1096_p3 = por %p1095_p13, %p1094_p10 }
  0x63   : > { %893 = vmatpush3.bf16.msra.mxu0 %v1007_v3  ;;  %873 = vmatpush3.bf16.msra.mxu1 %v1017_v10  ;;  %v324_v29 = vrot.slane %v322_v24, 1  ;;  %v329_v34 = vrot.slane %v327_v30, 1 }
  0x64   : > { %894 = vmatprep.subr.bf16.mxu0 %v1197_v0  ;;  %874 = vmatprep.subr.bf16.mxu1 %v1197_v0  ;;  %v532_v44 = vsel %vm529_vm6, %v530_v42, %v531_v43  ;;  %p1097_p7 = pnand %p1096_p3, %p1090_p8 }
  0x65   : > { %v325_v33 = vor.u32 %v324_v29, %v320_v28 }
  0x67   : > { %895 = vmatpush3.bf16.msra.mxu0 %v1008_v5  ;;  %875 = vmatpush3.bf16.msra.mxu1 %v1019_v14  ;;  %v330_v36 = vsel %vm318_vm5, %v325_v33, %v329_v34 }
  0x68   : > { %896 = vmatprep.subr.bf16.mxu0 %v1197_v0  ;;  %876 = vmatprep.subr.bf16.mxu1 %v1197_v0 }
  0x6b   : > { %897 = vmatpush3.bf16.msra.mxu0 %v1009_v7  ;;  %877 = vmatpush3.bf16.msra.mxu1 %v1021_v19 }
  0x6c   : > { %898 = vmatprep.subr.bf16.mxu0 %v1197_v0  ;;  %878 = vmatprep.subr.bf16.mxu1 %v1197_v0 }
  0x6f   : > { %899 = vmatpush3.bf16.msra.mxu0 %v1010_v11  ;;  %879 = vmatpush3.bf16.msra.mxu1 %v1023_v22 }
  0x70   : > { %900 = vmatprep.subr.bf16.mxu0 %v1197_v0  ;;  %880 = vmatprep.subr.bf16.mxu1 %v1197_v0 }
  0x73   : > { %901 = vmatpush3.bf16.msra.mxu0 %v1011_v16  ;;  %881 = vmatpush3.bf16.msra.mxu1 %v1025_v27 }
  0x74   : > { %902 = vmatprep.subr.bf16.mxu0 %v1197_v0  ;;  %882 = vmatprep.subr.bf16.mxu1 %v1197_v0 }
  0x77   : > { %903 = vmatpush3.bf16.msra.mxu0 %v1012_v21  ;;  %883 = vmatpush3.bf16.msra.mxu1 %v1027_v32 }
  0x78   : > { %908 = vmatprep.subr.bf16.mxu0 %v1197_v0 }
  0x7a   : > { %905 = vmatmul.mubr.msk.bf16.vlgmr.msra.gmra.mrb[0].mxu0 %vm821_vm4, %v822_v25  ;;  %885 = vmatmul.mubr.bf16.vlgmr.msra.gmra.mrb[0].mxu1 %v330_v36 }
  0x7b   : > { %909 = vmatpush3.bf16.msra.mxu0 %v1014_v26  ;;  %924 = vmatprep.mubr.msk.bf16.mxu0 %vm1198_vm0, %v1197_v0 }
  0x7c   : > { %910 = vmatprep.subr.bf16.mxu0 %v1197_v0 }
  0x7f   : > { %911 = vmatpush3.bf16.msra.mxu0 %v1016_v31 }
  0x80   : > { %912 = vmatprep.subr.bf16.mxu0 %v1197_v0 }
  0x83   : > { %913 = vmatpush3.bf16.msra.mxu0 %v1018_v35 }
  0x84   : > { %914 = vmatprep.subr.bf16.mxu0 %v1197_v0 }
  0x87   : > { %915 = vmatpush3.bf16.msra.mxu0 %v1020_v37 }
  0x88   : > { %916 = vmatprep.subr.bf16.mxu0 %v1197_v0 }
  0x8b   : > { %917 = vmatpush3.bf16.msra.mxu0 %v1022_v38 }
  0x8c   : > { %918 = vmatprep.subr.bf16.mxu0 %v1197_v0 }
  0x8f   : > { %919 = vmatpush3.bf16.msra.mxu0 %v1024_v39 }
  0x90   : > { %920 = vmatprep.subr.bf16.mxu0 %v1197_v0 }
  0x93   : > { %921 = vmatpush3.bf16.msra.mxu0 %v1026_v40 }
  0x94   : > { %922 = vmatprep.subr.bf16.mxu0 %v1197_v0 }
  0x97   : > { %923 = vmatpush3.bf16.msra.mxu0 %v1028_v41 }
  0x9a   : > { %925 = vmatmul.mubr.bf16.vlgmr.msra.gmra.mrb[0].mxu0 %v532_v44 }
 0x14d   : > { %v414_v45 = vpop.f32.mrb[0].mxu1 }
 0x14e   : > { %v886_v46 = vpop.f32.mrb[1].mxu1 }
 0x14f   : > { %v417_v47 = vpop.f32.mrb[2].mxu1 }
 0x150   : > { %v887_v48 = vpop.f32.mrb[3].mxu1 }
 0x16d   : > { %v616_v49 = vpop.f32.mrb[0].mxu0 }
 0x16e   : > { %v928_v50 = vadd.f32 %v616_v49, %v414_v45  ;;  %v926_v51 = vpop.f32.mrb[1].mxu0 }
 0x16f   : > { %v619_v52 = vpop.f32.mrb[2].mxu0 }
 0x170   : > { %625 = vst [vmem:[%s261_s22] sm:$0xff] %v928_v50  ;;  %v929_v53 = vadd.f32 %v619_v52, %v417_v47  ;;  %v927_v54 = vpop.f32.mrb[3].mxu0  ;;  %v634_v55 = vmul.f32 %v928_v50, %v928_v50 }
 0x172   : > { %626 = vst [vmem:[%s261_s22 + $0x8] sm:$0xff] %v929_v53  ;;  %v627_v56 = vadd.f32 %v929_v53, %v928_v50  ;;  %v635_v57 = vmul.f32 %v929_v53, %v929_v53 }
 0x173   : > { %1100 = shalt.err (!%p1097_p7)
}
 0x174   : > { %s1101_s27 = scalar_lea.hbm %s1434_s11, 256  ;;  %s1105_s13 = scalar_lea.hbm %s1514_s4, 512 }
 0x175   : > { %p1102_p9 = scmp.ne.s32.totalorder %s1434_s11, %s1101_s27  ;;  %p1106_p5 = scmp.lt.u32.totalorder %s1434_s11, %s1514_s4 }
 0x176   : > { %p1107_p11 = scmp.lt.u32.totalorder %s1105_s13, %s1101_s27  ;;  %p1109_p4 = scmp.lt.u32.totalorder %s1101_s27, %s1434_s11 }
 0x177   : > { %p1103_p2 = pnand %p1102_p9, %p1325_p12 }
 0x178   : > { %p1108_p1 = por %p1107_p11, %p1106_p5 }
 0x179   : > { %p1104_p0 = pneg %p1103_p2 }
 0x17a   : > { %p1110_p6 = por %p1109_p4, %p1108_p1 }
 0x17c   : > { %p1111_p8 = pnand %p1110_p6, %p1104_p0 }
 0x17e   : > { %1114 = shalt.err (!%p1111_p8)
}
 0x17f   : > { %s1201_s22 = smov 128   ;;  %s1202_s10 = smov 8   ;;  %v628_v58 = vrot.slane %v627_v56, 4  ;;  %v636_v59 = vadd.f32 %v635_v57, %v634_v55 }
 0x180   : > { %940 = dma.vmem_to_hbm [thread:$0]  (%p1325_p12), %s1429_s24, 256, %s1434_s11, %s646_s16, %s1201_s22, %s1201_s22, %s1202_s10  }
 0x181   : > { %v629_v60 = vadd.f32 %v628_v58, %v627_v56  ;;  %v637_v61 = vrot.slane %v636_v59, 4  ;;  %s803_s29 = sshll.u32 %s1373_s12, 1  ;;  %s836_s30 = sshll.u32 %s1255_s20, 5 }
 0x182   : > { %s268_s17 = scalar_lea.vmem [#allocation8], %s803_s29  ;;  %s1465_s16 = scalar_lea.hbm %s1515_s5, %s836_s30 }
 0x183   : > { %v630_v62 = vrot.slane %v629_v60, 2  ;;  %v638_v63 = vadd.f32 %v637_v61, %v636_v59  ;;  %s680_s6 = sshll.u32 %s268_s17, 4  ;;  %s651_s7 = scalar_lea.sflag [#allocation9], %s1373_s12  ;;  %s1467_s6 = int_to_ptr.vmem [resolvable:$true] %s680_s6 }
 0x184   : > { %s1115_s8 = scalar_lea.vmem %s1467_s6, 32  ;;  %s1203_s20 = smov [#allocation8]  }
 0x185   : > { %v631_v0 = vadd.f32 %v630_v62, %v629_v60  ;;  %v639_v1 = vrot.slane %v638_v63, 2  ;;  %p1116_p10 = scmp.ne.s32.totalorder %s1467_s6, %s1115_s8  ;;  %s1119_s27 = sshll.u32 %s1203_s20, 4  ;;  %s1120_s27 = int_to_ptr.vmem [resolvable:$false] %s1119_s27 }
 0x186   : > { %s1121_s9 = scalar_lea.vmem %s1120_s27, 64  ;;  %p1122_p7 = scmp.lt.s32.totalorder %s1467_s6, %s1120_s27 }
 0x187   : > { %v632_v2 = vrot.slane %v631_v0, 1  ;;  %v640_v3 = vadd.f32 %v639_v1, %v638_v63  ;;  %p1117_p13 = pnand %p1116_p10, %p1325_p12  ;;  %p1123_p9 = scmp.lt.s32.totalorder %s1121_s9, %s1115_s8 }
 0x189   : > { %v641_v4 = vrot.slane %v640_v3, 1  ;;  %v633_v5 = vadd.f32 %v632_v2, %v631_v0  ;;  %p1118_p3 = pneg %p1117_p13  ;;  %p1124_p2 = por %p1123_p9, %p1122_p7 }
 0x18b   : > { %v642_v6 = vadd.f32 %v641_v4, %v640_v3  ;;  %p1125_p0 = pnand %p1124_p2, %p1118_p3 }
 0x18d   : > { %v643_v7 = vsel %vm274_vm1, %v633_v5, %v642_v6 }
 0x18e   : > { %644 = vst [vmem:[%s268_s17] sm:$0x3] %v643_v7 }
 0x18f   : > { %1128 = shalt.err (!%p1125_p0)
}
 0x190   : > { %s1129_s12 = scalar_lea.hbm %s1465_s16, 32  ;;  %s1133_s14 = scalar_lea.hbm %s1515_s5, 64 }
 0x191   : > { %p1130_p5 = scmp.ne.s32.totalorder %s1465_s16, %s1129_s12  ;;  %p1134_p4 = scmp.lt.u32.totalorder %s1465_s16, %s1515_s5 }
 0x192   : > { %p1135_p6 = scmp.lt.u32.totalorder %s1133_s14, %s1129_s12  ;;  %p1137_p10 = scmp.lt.u32.totalorder %s1129_s12, %s1465_s16 }
 0x193   : > { %p1131_p11 = pnand %p1130_p5, %p1325_p12 }
 0x194   : > { %p1136_p8 = por %p1135_p6, %p1134_p4 }
 0x195   : > { %p1132_p1 = pneg %p1131_p11 }
 0x196   : > { %p1138_p13 = por %p1137_p10, %p1136_p8 }
 0x198   : > { %p1139_p3 = pnand %p1138_p13, %p1132_p1 }
 0x19a   : > { %1142 = shalt.err (!%p1139_p3)
}
 0x19b   : > { %941 = dma.vmem_to_hbm [thread:$0]  (%p1325_p12), %s1467_s6, 32, %s1465_s16, %s651_s7  }
 0x19c PF: > { %s692_s10 = sand.u32 1, %s1177_s1   ;;  %p1530_p7 = scmp.ne.s32.totalorder %s1520_s23, 0 }
 0x19d   : > { %p1531_p9 = scmp.ge.s32.totalorder %s1189_s19, 2  ;;  %s693_s29 = scalar_lea.sflag [#allocation4], %s692_s10 }
 0x19f   : > { %p953_p2 = pnand %p1531_p9, %p1530_p7 }
 0x1a1   : > { %1168 = dma.done.wait (!%p953_p2), %s693_s29, 256  }
 0x1a2   : > { %1170 = vsyncadd (!%p953_p2), %s693_s29, 4294967040  ;;  %s702_s30 = scalar_lea.sflag [#allocation9], %s692_s10 }
 0x1a3   : > { %1172 = dma.done.wait (!%p953_p2), %s702_s30, 32  }
 0x1a4   : > { %1174 = vsyncadd (!%p953_p2), %s702_s30, 4294967264  ;;  %p23_p12 = scmp.ge.s32.totalorder %s1290_s28, 4   ;;  %s1532_s1 = smov %s1181_s18 }
 0x1a5   : > { %s1533_s18 = smov %s1185_s2  ;;  %s1534_s2 = smov %s1321_s21 }
 0x1a6   : > { %s1535_s19 = smov %s1290_s28  ;;  %25 = sbr.rel (!%p23_p12) target bundleno = 8 (0x8), region = 104 }
 0x1ad   :  { %707 = vsyncpa [#allocation3], 1 }
 0x1ae   :  { %709 = vsyncpa [#allocation3 + $0x1], 1 }
 0x1af   :  { %710 = vsyncpa [#allocation6], 1 }
 0x1b0   :  { %711 = vsyncpa [#allocation4], 1 }
 0x1b1   :  { %713 = vsyncpa [#allocation4 + $0x1], 1 }
 0x1b2   :  { %714 = vsyncpa [#allocation9], 1 }
 0x1b3   :  { %716 = vsyncpa [#allocation9 + $0x1], 1 }

</bundles_post_ra>
